<compile_context>
chip_gen: v6e
topology: v6e:2x2x1
jax: 0.10.0
libtpu: 0.0.40
codegen_flags: <defaults>
</compile_context>

<pallas_src>
import functools

import jax
import jax.numpy as jnp
from jax.experimental import pallas as pl
from jax.experimental.pallas import tpu as pltpu


def _cdiv(a, b):
    return -(-a // b)


def _mixup_gather_kernel(order_ref, *refs, lam: float, num_group: int, tp: int):
    """refs = (x_{t=0,g=0}, ..., x_{t=tp-1,g=G-1}, out).

    x_{t,g} : (1, rt, 128) — row of group g at in-group position p*tp + t,
              gathered straight from the unsorted batch via the scalar-
              prefetched `order` table (the gather happens in the index maps).
    out     : (G, tp, rt, 128)
    """
    del order_ref  # only used inside the index maps
    n_in = num_group * tp
    in_refs = refs[:n_in]
    o_ref = refs[n_in]

    # mixed_g = lam*x_g + (1-lam)*mean_{g'!=g} x_{g'} = a*x_g + b*total
    b = (1.0 - lam) / float(num_group - 1)
    a = lam - b

    for t in range(tp):
        # f32 accumulation regardless of input dtype (free under HBM roofline)
        xs = [in_refs[t * num_group + g][0].astype(jnp.float32)
              for g in range(num_group)]
        total = xs[0]
        for x in xs[1:]:
            total = total + x
        bt = b * total                      # hoisted shared term
        for g in range(num_group):
            o_ref[g, t] = (a * xs[g] + bt).astype(o_ref.dtype)


def _in_index_map(p, r, order_ref, *, g, t, tp, per_group):
    # Row-gather: batch-axis block index == original row id of
    # (group g, in-group position p*tp + t); block size along batch is 1.
    return (order_ref[g * per_group + p * tp + t], r, 0)


def _out_index_map(p, r, order_ref):
    del order_ref
    return (0, p, r, 0)


def _choose_tiles(R, per_group, num_group, itemsize, budget):
    """Pick (row tile rt, #row tiles, positions-per-step tp)."""
    sub = 8 * max(1, 4 // itemsize)      # f32 -> 8, bf16 -> 16, int8/fp8 -> 32
    bytes_row = 128 * itemsize

    if R <= sub:
        rt = R                           # full second-to-last extent is allowed
    else:
        # largest sub-multiple <= R that keeps double-buffered in+out blocks
        # (4 * G * rt * 128 * itemsize at tp=1) within the VMEM budget
        rt_budget = (budget // (4 * num_group * bytes_row)) // sub * sub
        rt = max(sub, min((R // sub) * sub, rt_budget))
    n_r = _cdiv(R, rt)                   # partial edge block is fine

    tp = 1
    if n_r == 1:
        if per_group == 1:
            if R > sub:
                # give v7x's second TensorCore a tile to work on
                rt = max(sub, sub * _cdiv(_cdiv(R, 2), sub))
                n_r = _cdiv(R, rt)
        else:
            # batch in-group positions to amortize the per-grid-step overhead
            per_step = num_group * rt * bytes_row
            tp_target = max(1, (1 << 20) // per_step)                # ~1 MiB/step
            tp_target = min(tp_target, max(1, 64 // num_group))      # DMA/unroll cap
            tp_target = min(tp_target,
                            max(1, budget // (4 * num_group * rt * bytes_row)))
            tp_target = max(1, min(tp_target, per_group // 2))       # keep axis >= 2
            tp_target = min(tp_target, per_group)
            tp = max(d for d in range(1, tp_target + 1) if per_group % d == 0)
    return rt, n_r, tp


def _mixup_image_pallas(img3, order, num_group, per_group, lam):
    """img3: (B, R, 128) lane-dense view of the flattened images.

    Returns the mixed tensor (num_group, per_group, R, 128) in group-major
    (torch.cat) order.
    """
    B, R, L = img3.shape
    assert L == 128
    dtype = img3.dtype
    itemsize = jnp.dtype(dtype).itemsize

    # Per-chip VMEM budget (v7x: 64 MiB physical -> 32 MiB budget;
    # v5e/v6e: 128 MiB -> 64 MiB budget).
    try:
        vmem_cap = int(pltpu.get_tpu_info().vmem_capacity_bytes)
    except Exception:  # pragma: no cover - conservative fallback
        vmem_cap = 64 * 1024 * 1024
    budget = vmem_cap // 2

    rt, n_r, tp = _choose_tiles(R, per_group, num_group, itemsize, budget)
    grid = (per_group // tp, n_r)

    in_specs = [
        pl.BlockSpec((1, rt, 128),
                     functools.partial(_in_index_map, g=g, t=t, tp=tp,
                                       per_group=per_group))
        for t in range(tp) for g in range(num_group)
    ]
    out_spec = pl.BlockSpec((num_group, tp, rt, 128), _out_index_map)

    kernel = functools.partial(_mixup_gather_kernel, lam=float(lam),
                               num_group=num_group, tp=tp)

    # 2x double-buffered inputs + 2x double-buffered output blocks.
    block_bytes = 4 * num_group * tp * rt * 128 * itemsize
    vmem_limit = int(min(vmem_cap, block_bytes + 8 * 1024 * 1024))

    return pl.pallas_call(
        kernel,
        out_shape=jax.ShapeDtypeStruct((num_group, per_group, R, 128), dtype),
        grid_spec=pltpu.PrefetchScalarGridSpec(
            num_scalar_prefetch=1,
            grid=grid,
            in_specs=in_specs,
            out_specs=out_spec,
        ),
        compiler_params=pltpu.CompilerParams(
            dimension_semantics=("parallel", "parallel"),
            vmem_limit_bytes=vmem_limit,
        ),
    )(order, *([img3] * (tp * num_group)))


def _xla_group_blend(arr, order, num_group, per_group, a, b):
    """Gather + blend in plain XLA (used for targets / non-aligned features)."""
    srt = jnp.take(arr, order, axis=0)
    grp = srt.reshape((num_group, per_group) + arr.shape[1:]).astype(jnp.float32)
    tot = jnp.sum(grp, axis=0, keepdims=True)
    mix = a * grp + b * tot
    return mix.reshape((num_group * per_group,) + arr.shape[1:]).astype(arr.dtype)


def mixup_via_interpolations(batch_image: jax.Array,
                             batch_target: jax.Array,
                             batch_group: jax.Array,
                             num_group: int,
                             lam: float = 0.5):
    """JAX/Pallas equivalent of MixupViaInterpolations.forward."""
    B = batch_image.shape[0]
    assert num_group >= 2, "need at least two groups to interpolate"
    assert B % num_group == 0, "assume balanced groups (Mixup._slicing no-op)"
    per_group = B // num_group

    F = 1
    for d in batch_image.shape[1:]:
        F *= d

    # torch.where(group == i)[0] for i = 0..G-1, concatenated <=> stable sort.
    # Row of (group g, in-group position p) is order[g*per_group + p].
    order = jnp.argsort(batch_group, stable=True).astype(jnp.int32)

    b_coef = (1.0 - lam) / float(num_group - 1)
    a_coef = lam - b_coef

    if F % 128 == 0:
        R = F // 128
        img3 = batch_image.reshape(B, R, 128)       # lane-dense view, no pad
        mixed = _mixup_image_pallas(img3, order, num_group, per_group, lam)
        inputs_mix = mixed.reshape((B,) + batch_image.shape[1:])
    else:
        # TODO(synk): non-128-aligned feature count; XLA fallback avoids the
        # extra full-tensor pad + slice HBM passes a padded Pallas path costs.
        inputs_mix = _xla_group_blend(batch_image, order, num_group, per_group,
                                      a_coef, b_coef)

    # Targets are tiny (B, num_classes): fused XLA elementwise blend beats a
    # pallas_call with nearly-empty vregs and masked partial stores.
    targets_mix = _xla_group_blend(batch_target, order, num_group, per_group,
                                   a_coef, b_coef)
    return inputs_mix, targets_mix


def _reference(batch_image, batch_target, batch_group, num_group, lam=0.5):
    """Pure-JAX reference mirroring the PyTorch loop structure."""
    per_group = batch_image.shape[0] // num_group
    imgs, tgts = [], []
    for i in range(num_group):
        idx_i = jnp.where(batch_group == i, size=per_group)[0]
        img_o = batch_image[idx_i]
        tgt_o = batch_target[idx_i]
        img_others, tgt_others = [], []
        for j in range(num_group):
            if i != j:
                idx_j = jnp.where(batch_group == j, size=per_group)[0]
                img_others.append(batch_image[idx_j])
                tgt_others.append(batch_target[idx_j])
        img_int = jnp.stack(img_others).sum(0) / len(img_others)
        tgt_int = jnp.stack(tgt_others).sum(0) / len(tgt_others)
        imgs.append(lam * img_o + (1 - lam) * img_int)
        tgts.append(lam * tgt_o + (1 - lam) * tgt_int)
    return jnp.concatenate(imgs, 0), jnp.concatenate(tgts, 0)


def _run_case(key, B, C, H, W, num_group, num_classes, lam):
    k_img, k_tgt, k_perm = jax.random.split(key, 3)
    batch_image = jax.random.normal(k_img, (B, C, H, W), dtype=jnp.float32)
    labels = jax.random.randint(k_tgt, (B,), 0, num_classes)
    batch_target = jax.nn.one_hot(labels, num_classes, dtype=jnp.float32)
    batch_group = jax.random.permutation(
        k_perm,
        jnp.tile(jnp.arange(num_group, dtype=jnp.int32), B // num_group))

    inputs_mix, targets_mix = mixup_via_interpolations(
        batch_image, batch_target, batch_group, num_group, lam=lam)
    jax.block_until_ready((inputs_mix, targets_mix))

    ref_in, ref_tg = _reference(batch_image, batch_target, batch_group,
                                num_group, lam=lam)
    assert inputs_mix.shape == (B, C, H, W)
    assert targets_mix.shape == (B, num_classes)
    assert jnp.allclose(inputs_mix, ref_in, atol=1e-5)
    assert jnp.allclose(targets_mix, ref_tg, atol=1e-5)


if __name__ == "__main__":
    key = jax.random.PRNGKey(0)
    k1, k2 = jax.random.split(key)

    # Case 1: per_group = 2 (tp = 1 path).
    _run_case(k1, B=8, C=4, H=16, W=16, num_group=4, num_classes=8, lam=0.5)
    # Case 2: per_group = 4 (exercises position-batching, tp = 2).
    _run_case(k2, B=16, C=4, H=16, W=16, num_group=4, num_classes=8, lam=0.5)

    print("KERNEL_OK")
</pallas_src>

<mosaic_0001>
module attributes {stable_mosaic.version = 11 : i64} {
  func.func @_mixup_gather_kernel(%arg0: i32, %arg1: i32, %arg2: memref<8xi32, #tpu.memory_space<smem>>, %arg3: memref<1x8x128xf32, #tpu.memory_space<vmem>>, %arg4: memref<1x8x128xf32, #tpu.memory_space<vmem>>, %arg5: memref<1x8x128xf32, #tpu.memory_space<vmem>>, %arg6: memref<1x8x128xf32, #tpu.memory_space<vmem>>, %arg7: memref<4x1x8x128xf32, #tpu.memory_space<vmem>>) attributes {dimension_semantics = [#tpu.dimension_semantics<parallel>, #tpu.dimension_semantics<parallel>], iteration_bounds = array<i64: 2, 1>, scalar_prefetch = 1 : i64, scratch_operands = 0 : i64, tpu.core_type = #tpu.core_type<tc>, window_params = [{transform_indices = @transform_0, window_bounds = array<i64: 1, 8, 128>}, {transform_indices = @transform_1, window_bounds = array<i64: 1, 8, 128>}, {transform_indices = @transform_2, window_bounds = array<i64: 1, 8, 128>}, {transform_indices = @transform_3, window_bounds = array<i64: 1, 8, 128>}, {transform_indices = @transform_4, window_bounds = array<i64: 4, 1, 8, 128>}]} {
    %c0 = arith.constant 0 : index
    %c0_0 = arith.constant 0 : index
    %c0_1 = arith.constant 0 : index
    %0 = vector.load %arg3[%c0, %c0_0, %c0_1] : memref<1x8x128xf32, #tpu.memory_space<vmem>>, vector<1x8x128xf32>
    %1 = vector.shape_cast %0 : vector<1x8x128xf32> to vector<8x128xf32>
    %c0_2 = arith.constant 0 : index
    %c0_3 = arith.constant 0 : index
    %c0_4 = arith.constant 0 : index
    %2 = vector.load %arg4[%c0_2, %c0_3, %c0_4] : memref<1x8x128xf32, #tpu.memory_space<vmem>>, vector<1x8x128xf32>
    %3 = vector.shape_cast %2 : vector<1x8x128xf32> to vector<8x128xf32>
    %c0_5 = arith.constant 0 : index
    %c0_6 = arith.constant 0 : index
    %c0_7 = arith.constant 0 : index
    %4 = vector.load %arg5[%c0_5, %c0_6, %c0_7] : memref<1x8x128xf32, #tpu.memory_space<vmem>>, vector<1x8x128xf32>
    %5 = vector.shape_cast %4 : vector<1x8x128xf32> to vector<8x128xf32>
    %c0_8 = arith.constant 0 : index
    %c0_9 = arith.constant 0 : index
    %c0_10 = arith.constant 0 : index
    %6 = vector.load %arg6[%c0_8, %c0_9, %c0_10] : memref<1x8x128xf32, #tpu.memory_space<vmem>>, vector<1x8x128xf32>
    %7 = vector.shape_cast %6 : vector<1x8x128xf32> to vector<8x128xf32>
    %8 = arith.addf %1, %3 : vector<8x128xf32>
    %9 = arith.addf %8, %5 : vector<8x128xf32>
    %10 = arith.addf %9, %7 : vector<8x128xf32>
    %cst = arith.constant 0.166666672 : f32
    %11 = vector.broadcast %cst : f32 to vector<8x128xf32>
    %12 = arith.mulf %11, %10 : vector<8x128xf32>
    %cst_11 = arith.constant 0.333333343 : f32
    %13 = vector.broadcast %cst_11 : f32 to vector<8x128xf32>
    %14 = arith.mulf %13, %1 : vector<8x128xf32>
    %15 = arith.addf %14, %12 : vector<8x128xf32>
    %c0_12 = arith.constant 0 : index
    %c0_13 = arith.constant 0 : index
    %c0_14 = arith.constant 0 : index
    %c0_15 = arith.constant 0 : index
    %16 = vector.load %arg7[%c0_12, %c0_13, %c0_14, %c0_15] : memref<4x1x8x128xf32, #tpu.memory_space<vmem>>, vector<1x1x8x128xf32>
    %17 = vector.shape_cast %16 : vector<1x1x8x128xf32> to vector<8x128xf32>
    %18 = vector.shape_cast %15 : vector<8x128xf32> to vector<1x1x8x128xf32>
    tpu.vector_store %arg7[%c0_12, %c0_13, %c0_14, %c0_15], %18 {strides = array<i32>} : memref<4x1x8x128xf32, #tpu.memory_space<vmem>>, vector<1x1x8x128xf32>,
    %cst_16 = arith.constant 0.333333343 : f32
    %19 = vector.broadcast %cst_16 : f32 to vector<8x128xf32>
    %20 = arith.mulf %19, %3 : vector<8x128xf32>
    %21 = arith.addf %20, %12 : vector<8x128xf32>
    %c1 = arith.constant 1 : index
    %c0_17 = arith.constant 0 : index
    %c0_18 = arith.constant 0 : index
    %c0_19 = arith.constant 0 : index
    %22 = vector.load %arg7[%c1, %c0_17, %c0_18, %c0_19] : memref<4x1x8x128xf32, #tpu.memory_space<vmem>>, vector<1x1x8x128xf32>
    %23 = vector.shape_cast %22 : vector<1x1x8x128xf32> to vector<8x128xf32>
    %24 = vector.shape_cast %21 : vector<8x128xf32> to vector<1x1x8x128xf32>
    tpu.vector_store %arg7[%c1, %c0_17, %c0_18, %c0_19], %24 {strides = array<i32>} : memref<4x1x8x128xf32, #tpu.memory_space<vmem>>, vector<1x1x8x128xf32>,
    %cst_20 = arith.constant 0.333333343 : f32
    %25 = vector.broadcast %cst_20 : f32 to vector<8x128xf32>
    %26 = arith.mulf %25, %5 : vector<8x128xf32>
    %27 = arith.addf %26, %12 : vector<8x128xf32>
    %c2 = arith.constant 2 : index
    %c0_21 = arith.constant 0 : index
    %c0_22 = arith.constant 0 : index
    %c0_23 = arith.constant 0 : index
    %28 = vector.load %arg7[%c2, %c0_21, %c0_22, %c0_23] : memref<4x1x8x128xf32, #tpu.memory_space<vmem>>, vector<1x1x8x128xf32>
    %29 = vector.shape_cast %28 : vector<1x1x8x128xf32> to vector<8x128xf32>
    %30 = vector.shape_cast %27 : vector<8x128xf32> to vector<1x1x8x128xf32>
    tpu.vector_store %arg7[%c2, %c0_21, %c0_22, %c0_23], %30 {strides = array<i32>} : memref<4x1x8x128xf32, #tpu.memory_space<vmem>>, vector<1x1x8x128xf32>,
    %cst_24 = arith.constant 0.333333343 : f32
    %31 = vector.broadcast %cst_24 : f32 to vector<8x128xf32>
    %32 = arith.mulf %31, %7 : vector<8x128xf32>
    %33 = arith.addf %32, %12 : vector<8x128xf32>
    %c3 = arith.constant 3 : index
    %c0_25 = arith.constant 0 : index
    %c0_26 = arith.constant 0 : index
    %c0_27 = arith.constant 0 : index
    %34 = vector.load %arg7[%c3, %c0_25, %c0_26, %c0_27] : memref<4x1x8x128xf32, #tpu.memory_space<vmem>>, vector<1x1x8x128xf32>
    %35 = vector.shape_cast %34 : vector<1x1x8x128xf32> to vector<8x128xf32>
    %36 = vector.shape_cast %33 : vector<8x128xf32> to vector<1x1x8x128xf32>
    tpu.vector_store %arg7[%c3, %c0_25, %c0_26, %c0_27], %36 {strides = array<i32>} : memref<4x1x8x128xf32, #tpu.memory_space<vmem>>, vector<1x1x8x128xf32>,
    return
  }
  func.func @transform_0(%arg0: i32, %arg1: i32, %arg2: memref<8xi32, #tpu.memory_space<smem>>) -> (i32, i32, i32) {
    %c1_i32 = arith.constant 1 : i32
    %0 = arith.muli %arg0, %c1_i32 : i32
    %c0_i32 = arith.constant 0 : i32
    %1 = arith.addi %c0_i32, %0 : i32
    %c0_i32_0 = arith.constant 0 : i32
    %2 = arith.addi %1, %c0_i32_0 : i32
    %3 = arith.index_cast %2 : i32 to index
    %4 = memref.load %arg2[%3] : memref<8xi32, #tpu.memory_space<smem>>
    %c0_i32_1 = arith.constant 0 : i32
    %c0_i32_2 = arith.constant 0 : i32
    return %4, %arg1, %c0_i32_1 : i32, i32, i32
  }
  func.func @transform_1(%arg0: i32, %arg1: i32, %arg2: memref<8xi32, #tpu.memory_space<smem>>) -> (i32, i32, i32) {
    %c1_i32 = arith.constant 1 : i32
    %0 = arith.muli %arg0, %c1_i32 : i32
    %c2_i32 = arith.constant 2 : i32
    %1 = arith.addi %c2_i32, %0 : i32
    %c0_i32 = arith.constant 0 : i32
    %2 = arith.addi %1, %c0_i32 : i32
    %3 = arith.index_cast %2 : i32 to index
    %4 = memref.load %arg2[%3] : memref<8xi32, #tpu.memory_space<smem>>
    %c0_i32_0 = arith.constant 0 : i32
    %c0_i32_1 = arith.constant 0 : i32
    return %4, %arg1, %c0_i32_0 : i32, i32, i32
  }
  func.func @transform_2(%arg0: i32, %arg1: i32, %arg2: memref<8xi32, #tpu.memory_space<smem>>) -> (i32, i32, i32) {
    %c1_i32 = arith.constant 1 : i32
    %0 = arith.muli %arg0, %c1_i32 : i32
    %c4_i32 = arith.constant 4 : i32
    %1 = arith.addi %c4_i32, %0 : i32
    %c0_i32 = arith.constant 0 : i32
    %2 = arith.addi %1, %c0_i32 : i32
    %3 = arith.index_cast %2 : i32 to index
    %4 = memref.load %arg2[%3] : memref<8xi32, #tpu.memory_space<smem>>
    %c0_i32_0 = arith.constant 0 : i32
    %c0_i32_1 = arith.constant 0 : i32
    return %4, %arg1, %c0_i32_0 : i32, i32, i32
  }
  func.func @transform_3(%arg0: i32, %arg1: i32, %arg2: memref<8xi32, #tpu.memory_space<smem>>) -> (i32, i32, i32) {
    %c1_i32 = arith.constant 1 : i32
    %0 = arith.muli %arg0, %c1_i32 : i32
    %c6_i32 = arith.constant 6 : i32
    %1 = arith.addi %c6_i32, %0 : i32
    %c0_i32 = arith.constant 0 : i32
    %2 = arith.addi %1, %c0_i32 : i32
    %3 = arith.index_cast %2 : i32 to index
    %4 = memref.load %arg2[%3] : memref<8xi32, #tpu.memory_space<smem>>
    %c0_i32_0 = arith.constant 0 : i32
    %c0_i32_1 = arith.constant 0 : i32
    return %4, %arg1, %c0_i32_0 : i32, i32, i32
  }
  func.func @transform_4(%arg0: i32, %arg1: i32, %arg2: memref<8xi32, #tpu.memory_space<smem>>) -> (i32, i32, i32, i32) {
    %c0_i32 = arith.constant 0 : i32
    %c0_i32_0 = arith.constant 0 : i32
    %c0_i32_1 = arith.constant 0 : i32
    return %c0_i32, %arg0, %arg1, %c0_i32_0 : i32, i32, i32, i32
  }
}

</mosaic_0001>

<bundles_post_ra>
// kernel: tpu_custom_call.1
= control target key start
LH: loop header
LB: loop body
LE: loop exit
PB: predicated region body
PF: predicated region fallthrough
CT: control target
= control target key end

     0   :  { %s1099_s18 = smov [#allocation3]   ;;  %s1649_s0 = inlined_call_operand.hbm [shape: s32[8], index: 0, kind: input, shape index: {}]   ;;  %s1650_s1 = inlined_call_operand.hbm [shape: f32[8,8,128], index: 1, kind: input, shape index: {}]   ;;  %s1651_s2 = inlined_call_operand.hbm [shape: f32[8,8,128], index: 2, kind: input, shape index: {}]   ;;  %s1652_s3 = inlined_call_operand.hbm [shape: f32[8,8,128], index: 3, kind: input, shape index: {}]   ;;  %s1653_s4 = inlined_call_operand.hbm [shape: f32[8,8,128], index: 4, kind: input, shape index: {}]   ;;  %s1654_s5 = inlined_call_operand.hbm [shape: f32[4,2,8,128], index: 5, kind: output, shape index: {}]  }
   0x1   :  { %1683 = sst [smem:[#allocation42_spill]] %s1650_s1 }
   0x2   :  { %1684 = sst [smem:[#allocation43_spill]] %s1651_s2 }
   0x3   :  { %1685 = sst [smem:[#allocation44_spill]] %s1652_s3 }
   0x4   :  { %1686 = sst [smem:[#allocation45_spill]] %s1653_s4 }
   0x5   :  { %1687 = sst [smem:[#allocation46_spill]] %s1654_s5 }
   0x6   :  { %11 = dma.hbm_to_smem %s1649_s0, 16, %s1099_s18, [#allocation2] }
   0x7   :  { %1005 = dma.done.wait [#allocation2], 16 }
   0x8   :  { %1006 = vsyncadd [#allocation2], 4294967280 }
   0x9   :  { %13 = sfence }
   0xa   :  { %14 = vsyncpa [#allocation5], 0 }
   0xb   :  { %16 = vsyncpa [#allocation5 + $0x1], 0 }
   0xc   :  { %17 = vsyncpa [#allocation8], 0 }
   0xd   :  { %19 = vsyncpa [#allocation8 + $0x1], 0 }
   0xe   :  { %20 = vsyncpa [#allocation11], 0 }
   0xf   :  { %22 = vsyncpa [#allocation11 + $0x1], 0 }
  0x10   :  { %23 = vsyncpa [#allocation6], 0 }
  0x11   :  { %25 = vsyncpa [#allocation6 + $0x1], 0  ;;  %s1141_s21 = smov 0   ;;  %s1143_s22 = smov 0  }
  0x12   :  { %s1145_s23 = smov 0   ;;  %s1147_s24 = smov 0  }
  0x13   :  { %s1149_s0 = smov 0   ;;  %s1151_s25 = smov 0  }
  0x14   :  { %s1153_s26 = smov 0   ;;  %s1155_s27 = smov 0  }
  0x15   :  { %s1157_s28 = smov 0   ;;  %s1159_s29 = smov 0  }
  0x16   :  { %s1161_s30 = smov 0   ;;  %s1163_s6 = smov 0  }
  0x17   :  { %s1165_s7 = smov 0   ;;  %s1167_s8 = smov 0  }
  0x18   :  { %s1169_s9 = smov 0   ;;  %s1171_s10 = smov 0  }
  0x19   :  { %s1173_s11 = smov 0   ;;  %s1175_s12 = smov 0  }
  0x1a LB: > { %1688 = sst [smem:[#allocation27_spill]] %s1029_s21  ;;  %s1230_s13 = sadd.s32 4294967295, %s1097_s12   ;;  %s1097_s12 = sphi %s1175_s12, %s31_s12   ;;  %s1093_s11 = sphi %s1173_s11, %s1783_s11   ;;  %s1089_s10 = sphi %s1171_s10, %s1782_s10   ;;  %s1085_s9 = sphi %s1169_s9, %s1781_s9   ;;  %s1081_s8 = sphi %s1167_s8, %s1780_s8   ;;  %s1077_s7 = sphi %s1165_s7, %s1779_s7   ;;  %s1073_s6 = sphi %s1163_s6, %s1770_s6   ;;  %s1069_s30 = sphi %s1161_s30, %s1769_s30   ;;  %s1065_s29 = sphi %s1159_s29, %s1768_s29   ;;  %s1061_s28 = sphi %s1157_s28, %s1778_s28   ;;  %s1057_s27 = sphi %s1155_s27, %s1777_s27   ;;  %s1053_s26 = sphi %s1153_s26, %s1776_s26   ;;  %s1049_s25 = sphi %s1151_s25, %s1775_s25   ;;  %s1045_s0 = sphi %s1149_s0, %s1774_s0   ;;  %s1041_s24 = sphi %s1147_s24, %s1773_s24   ;;  %s1037_s23 = sphi %s1145_s23, %s1767_s23   ;;  %s1033_s22 = sphi %s1143_s22, %s1766_s22   ;;  %s1029_s21 = sphi %s1141_s21, %s1765_s21  }
  0x1b   : > { %1689 = sst [smem:[#allocation28_spill]] %s1033_s22  ;;  %s570_s14 = sadd.s32 4294967294, %s1097_s12  }
  0x1c   : > { %1690 = sst [smem:[#allocation29_spill]] %s1037_s23  ;;  %s43_s15 = sadd.s32 1, %s1093_s11 }
  0x1d   : > { %1691 = sst [smem:[#allocation30_spill]] %s1069_s30  ;;  %p1671_p0 = scmp.eq.s32.totalorder %s1097_s12, 0 }
  0x1e   : > { %1692 = sst [smem:[#allocation31_spill]] %s1073_s6  ;;  %p45_p1 = scmp.ge.s32.totalorder %s43_s15, 2 }
  0x1f   : > { %1693 = sst [smem:[#allocation32_spill]] %s1085_s9  ;;  %p1670_p2 = scmp.eq.s32.totalorder %s1230_s13, 0 }
  0x20   : > { %1694 = sst [smem:[#allocation33_spill]] %s1089_s10  ;;  %s1657_s16 = sadd.s32 2, %s1093_s11 }
  0x21   : > { %s86_s17 = sadd.s32 1, %s1073_s6  ;;  %s1785_s15 = smov (%p45_p1, %s43_s15), 0 }
  0x22   : > { %s78_s18 = sld [smem:[#allocation3 + %s1657_s16]]  ;;  %p93_p3 = scmp.ne.s32.totalorder %s1073_s6, %s1069_s30 }
  0x23   : > { %s79_s19 = sadd.s32 2, %s1785_s15  ;;  %p99_p4 = scmp.ne.s32.totalorder %s1069_s30, %s1065_s29 }
  0x24   : > { %s80_s20 = sld [smem:[#allocation3 + %s79_s19]]  ;;  %p1248_p5 = por %p93_p3, %p1671_p0 }
  0x25   : > { %p1254_p6 = por %p99_p4, %p1670_p2  ;;  %s173_s4 = ssub.s32 %s1093_s11, %s1785_s15 }
  0x26   : > { %p176_p7 = scmp.eq.s32.totalorder %s173_s4, 0  ;;  %s178_s16 = sadd.s32 1, %s1037_s23 }
  0x27   : > { %s1696_s10 = scalar_select %p1254_p6, 1, 0 }
  0x28   : > { %p188_p8 = scmp.ne.s32.totalorder %s1037_s23, %s1033_s22  ;;  %p189_p9 = scmp.eq.s32.totalorder %s1230_s13, 1 }
  0x29   : > { %1697 = sst [smem:[#allocation34_spill]] %s1696_s10  ;;  %p194_p11 = scmp.ne.s32.totalorder %s1033_s22, %s1029_s21 }
  0x2a   : > { %s1265_s29 = scalar_select %p176_p7, %s1037_s23, %s178_s16  }
  0x2b   : > { %p1267_p10 = por %p189_p9, %p188_p8  ;;  %s81_s10 = ssub.s32 %s78_s18, %s80_s20 }
  0x2c   : > { %1698 = sst [smem:[#allocation35_spill]] %s1265_s29  ;;  %p195_p12 = scmp.eq.s32.totalorder %s570_s14, 1 }
  0x2d   : > { %s1699_s19 = scalar_select %p1267_p10, 1, 0 }
  0x2e   : > { %p84_p13 = scmp.eq.s32.totalorder %s81_s10, 0  ;;  %p1274_p3 = por %p195_p12, %p194_p11 }
  0x2f   : > { %1700 = sst [smem:[#allocation36_spill]] %s1699_s19  ;;  %p1669_p4 = scmp.lt.s32.totalorder %s1097_s12, 2 }
  0x30   : > { %s1701_s4 = scalar_select %p1274_p3, 1, 0 }
  0x31   : > { %s1280_s16 = scalar_select %p84_p13, %s1073_s6, %s86_s17  }
  0x32   : > { %1702 = sst [smem:[#allocation37_spill]] %s1701_s4  ;;  %s235_s29 = sand.u32 1, %s1097_s12  }
  0x33   : > { %1703 = sst [smem:[#allocation38_spill]] %s1280_s16  ;;  %s237_s23 = sand.u32 1, %s1073_s6  }
  0x34   : > { %s575_s30 = sshll.u32 %s237_s23, 3  ;;  %p1288_p7 = pnand %p1669_p4, %p1248_p5 }
  0x35   : > { %s597_s10 = scalar_select %p1248_p5, [#allocation3], [#allocation14] }
  0x36   : > { %s1705_s14 = sadd.s32 2, %s1093_s11  ;;  %s239_s17 = scalar_lea.vmem [#allocation7], %s575_s30 }
  0x37   : > { %s1787_s14 = smov (!%p1248_p5, %s1705_s14), 0  ;;  %s1789_s10 = smov (!%p1669_p4, %s597_s10), [#allocation18] }
  0x38   : > { %s1791_s14 = smov (!%p1669_p4, %s1787_s14), 0  ;;  %s249_s20 = sshll.u32 %s239_s17, 4  ;;  %s1302_s20 = int_to_ptr.vmem [resolvable:$true] %s249_s20 }
  0x39   : > { %s241_s16 = sld [smem:[%s1789_s10 + %s1791_s14]]  ;;  %p581_p8 = scmp.ge.s32.totalorder %s1097_s12, 1 }
  0x3a   : > { %p296_p9 = scmp.lt.s32.totalorder %s1097_s12, 3  ;;  %s1708_s2 = sld [smem:[#allocation43_spill]] }
  0x3b   : > { %s1314_s19 = sld [smem:[#allocation3 + %s1093_s11]]  ;;  %s1316_s22 = scalar_lea.sflag [#allocation8], %s235_s29 }
  0x3c   : > { %p1306_p11 = pnand %p581_p8, %p296_p9  ;;  %p797_p12 = pneg %p1288_p7 }
  0x3e   : > { %s1706_s23 = scalar_select %p1306_p11, 1, 0 }
  0x3f   : > { %s576_s6 = sshll.u32 %s241_s16, 7 }
  0x40   : > { %1707 = sst [smem:[#allocation39_spill]] %s1706_s23  ;;  %s247_s21 = scalar_lea.hbm %s1708_s2, %s576_s6 }
  0x41   : > { %s795_s30 = scalar_lea.hbm %s247_s21, 128  ;;  %s800_s17 = scalar_lea.hbm %s1708_s2, 1024 }
  0x42   : > { %p796_p5 = scmp.ne.s32.totalorder %s247_s21, %s795_s30  ;;  %p801_p8 = scmp.lt.s32.totalorder %s247_s21, %s1708_s2 }
  0x43   : > { %p802_p9 = scmp.lt.s32.totalorder %s800_s17, %s795_s30 }
  0x44   : > { %p798_p13 = pnand %p797_p12, %p796_p5 }
  0x45   : > { %p803_p4 = por %p802_p9, %p801_p8 }
  0x46   : > { %p799_p1 = pneg %p798_p13 }
  0x48   : > { %p804_p2 = pnand %p803_p4, %p799_p1 }
  0x4a   : > { %807 = shalt.err (!%p804_p2)
}
  0x4b   : > { %s808_s6 = scalar_lea.vmem %s1302_s20, 128  ;;  %s1100_s29 = smov [#allocation7]  }
  0x4c   : > { %p809_p0 = scmp.ne.s32.totalorder %s1302_s20, %s808_s6  ;;  %s813_s4 = sshll.u32 %s1100_s29, 4  ;;  %s814_s4 = int_to_ptr.vmem [resolvable:$false] %s813_s4 }
  0x4d   : > { %s815_s5 = scalar_lea.vmem %s814_s4, 256  ;;  %p816_p13 = scmp.lt.s32.totalorder %s1302_s20, %s814_s4 }
  0x4e   : > { %p811_p3 = pnand %p809_p0, %p797_p12  ;;  %p817_p10 = scmp.lt.s32.totalorder %s815_s5, %s808_s6 }
  0x50   : > { %p812_p5 = pneg %p811_p3  ;;  %p818_p6 = por %p817_p10, %p816_p13 }
  0x52   : > { %p819_p11 = pnand %p818_p6, %p812_p5 }
  0x54   : > { %822 = shalt.err (!%p819_p11)
}
  0x55   : > { %622 = dma.hbm_to_vmem [thread:$0]  (!%p1288_p7), %s247_s21, 128, %s1302_s20, %s1316_s22  }
  0x56   : > { %s48_s23 = sld [smem:[#allocation3 + %s1785_s15]]  ;;  %s54_s30 = sadd.s32 1, %s1085_s9 }
  0x57   : > { %p61_p0 = scmp.ne.s32.totalorder %s1085_s9, %s1081_s8  ;;  %p67_p2 = scmp.ne.s32.totalorder %s1081_s8, %s1077_s7 }
  0x58   : > { %s215_s18 = sand.u32 1, %s1085_s9   ;;  %p1709_p6 = scmp.eq.s32.totalorder %s1097_s12, 0 }
  0x59   : > { %p1711_p1 = scmp.eq.s32.totalorder %s1230_s13, 0  ;;  %s573_s20 = sshll.u32 %s215_s18, 3 }
  0x5a   : > { %p1342_p10 = por %p1709_p6, %p61_p0  ;;  %p1714_p4 = scmp.lt.s32.totalorder %s1097_s12, 2 }
  0x5b   : > { %p1348_p3 = por %p1711_p1, %p67_p2  ;;  %s219_s17 = scalar_lea.vmem [#allocation4], %s573_s20 }
  0x5c   : > { %p1356_p7 = pnand %p1714_p4, %p1342_p10  ;;  %s49_s14 = ssub.s32 %s1314_s19, %s48_s23 }
  0x5d   : > { %s1712_s21 = scalar_select %p1348_p3, 1, 0 }
  0x5e   : > { %s228_s16 = sshll.u32 %s219_s17, 4  ;;  %p52_p11 = scmp.eq.s32.totalorder %s49_s14, 0  ;;  %s1361_s16 = int_to_ptr.vmem [resolvable:$true] %s228_s16 }
  0x5f   : > { %1713 = sst [smem:[#allocation40_spill]] %s1712_s21  ;;  %p1717_p12 = pmov %p1714_p4 }
  0x60   : > { %s594_s6 = scalar_select %p1342_p10, [#allocation3], [#allocation13] }
  0x61   : > { %s1366_s29 = scalar_select %p52_p11, %s1085_s9, %s54_s30  }
  0x62   : > { %s595_s4 = scalar_select %p1342_p10, %s1093_s11, 0 }
  0x63   : > { %1716 = sst [smem:[#allocation41_spill]] %s1366_s29  ;;  %s1793_s6 = smov (!%p1717_p12, %s594_s6), [#allocation17] }
  0x64   : > { %p1718_p8 = pmov %p1714_p4  ;;  %s1677_s5 = sadd.s32 4, %s1093_s11 }
  0x65   : > { %s1378_s23 = sld [smem:[#allocation3 + %s1677_s5]]  ;;  %s111_s20 = sadd.s32 4, %s1785_s15 }
  0x66   : > { %s1795_s4 = smov (!%p1718_p8, %s595_s4), 0  ;;  %s1381_s14 = sld [smem:[#allocation3 + %s111_s20]] }
  0x67   : > { %s220_s19 = sld [smem:[%s1793_s6 + %s1795_s4]]  ;;  %p125_p9 = scmp.ne.s32.totalorder %s1061_s28, %s1057_s27 }
  0x68   : > { %s1719_s1 = sld [smem:[#allocation42_spill]]  ;;  %p1720_p13 = pmov %p1709_p6 }
  0x69   : > { %s216_s6 = scalar_lea.sflag [#allocation5], %s215_s18  ;;  %p825_p6 = pneg %p1356_p7 }
  0x6a   : > { %p1394_p0 = por %p125_p9, %p1720_p13 }
  0x6c   : > { %s1721_s21 = scalar_select %p1394_p0, 1, 0 }
  0x6d   : > { %s574_s30 = sshll.u32 %s220_s19, 7 }
  0x6e   : > { %s226_s9 = scalar_lea.hbm %s1719_s1, %s574_s30  ;;  %s828_s19 = scalar_lea.hbm %s1719_s1, 1024 }
  0x6f   : > { %s823_s4 = scalar_lea.hbm %s226_s9, 128  ;;  %p829_p4 = scmp.lt.s32.totalorder %s226_s9, %s1719_s1 }
  0x70   : > { %p824_p2 = scmp.ne.s32.totalorder %s226_s9, %s823_s4  ;;  %p830_p11 = scmp.lt.s32.totalorder %s828_s19, %s823_s4 }
  0x72   : > { %p826_p10 = pnand %p825_p6, %p824_p2  ;;  %p831_p12 = por %p830_p11, %p829_p4 }
  0x74   : > { %p827_p1 = pneg %p826_p10 }
  0x76   : > { %p832_p8 = pnand %p831_p12, %p827_p1 }
  0x78   : > { %835 = shalt.err (!%p832_p8)
}
  0x79   : > { %s836_s18 = scalar_lea.vmem %s1361_s16, 128  ;;  %s1101_s29 = smov [#allocation4]  }
  0x7a   : > { %p837_p9 = scmp.ne.s32.totalorder %s1361_s16, %s836_s18  ;;  %s841_s30 = sshll.u32 %s1101_s29, 4  ;;  %s842_s30 = int_to_ptr.vmem [resolvable:$false] %s841_s30 }
  0x7b   : > { %s843_s5 = scalar_lea.vmem %s842_s30, 256  ;;  %p844_p10 = scmp.lt.s32.totalorder %s1361_s16, %s842_s30 }
  0x7c   : > { %p839_p13 = pnand %p837_p9, %p825_p6  ;;  %p845_p5 = scmp.lt.s32.totalorder %s843_s5, %s836_s18 }
  0x7e   : > { %p840_p2 = pneg %p839_p13  ;;  %p846_p3 = por %p845_p5, %p844_p10 }
  0x80   : > { %p847_p0 = pnand %p846_p3, %p840_p2 }
  0x82   : > { %850 = shalt.err (!%p847_p0)
}
  0x83   : > { %617 = dma.hbm_to_vmem [thread:$0]  (!%p1356_p7), %s226_s9, 128, %s1361_s16, %s216_s6  }
  0x84   : > { %p1722_p3 = scmp.eq.s32.totalorder %s1230_s13, 0  ;;  %p1723_p5 = scmp.ne.s32.totalorder %s1057_s27, %s1053_s26 }
  0x85   : > { %s1725_s7 = sand.u32 1, %s1061_s28   ;;  %s113_s10 = ssub.s32 %s1378_s23, %s1381_s14 }
  0x86   : > { %p1417_p0 = por %p1723_p5, %p1722_p3  ;;  %s577_s17 = sshll.u32 %s1725_s7, 3 }
  0x87   : > { %p116_p6 = scmp.eq.s32.totalorder %s113_s10, 0  ;;  %s260_s4 = scalar_lea.vmem [#allocation9], %s577_s17 }
  0x88   : > { %s1724_s2 = scalar_select %p1417_p0, 1, 0 }
  0x89   : > { %s270_s20 = sshll.u32 %s260_s4, 4  ;;  %p1726_p1 = scmp.ne.s32.totalorder %s1721_s21, 0  ;;  %s1448_s20 = int_to_ptr.vmem [resolvable:$true] %s270_s20 }
  0x8a   : > { %s1727_s18 = sadd.s32 1, %s1061_s28  ;;  %s1728_s26 = sadd.s32 4, %s1093_s11 }
  0x8b   : > { %s600_s19 = scalar_select %p1726_p1, [#allocation3], [#allocation15] }
  0x8c   : > { %s1430_s9 = scalar_select %p116_p6, %s1061_s28, %s1727_s18  }
  0x8d   : > { %s1797_s26 = smov (!%p1726_p1, %s1728_s26), 0  ;;  %p1729_p7 = scmp.lt.s32.totalorder %s1097_s12, 2 }
  0x8e   : > { %s1680_s14 = sadd.s32 6, %s1093_s11  ;;  %s143_s6 = sadd.s32 6, %s1785_s15 }
  0x8f   : > { %s1799_s19 = smov (!%p1729_p7, %s600_s19), [#allocation19]  ;;  %p1730_p4 = pmov %p1729_p7 }
  0x90   : > { %s1454_s29 = sld [smem:[#allocation3 + %s1680_s14]] }
  0x91   : > { %s1801_s26 = smov (!%p1730_p4, %s1797_s26), 0  ;;  %p1731_p11 = pmov %p1730_p4 }
  0x92   : > { %s262_s23 = sld [smem:[%s1799_s19 + %s1801_s26]] }
  0x93   : > { %p1444_p12 = pnand %p1731_p11, %p1726_p1  ;;  %s1456_s5 = sld [smem:[#allocation3 + %s143_s6]] }
  0x94   : > { %s1733_s3 = sld [smem:[#allocation44_spill]] }
  0x95   : > { %p853_p13 = pneg %p1444_p12 }
  0x98   : > { %s578_s30 = sshll.u32 %s262_s23, 7 }
  0x9a   : > { %s268_s21 = scalar_lea.hbm %s1733_s3, %s578_s30  ;;  %s856_s18 = scalar_lea.hbm %s1733_s3, 1024 }
  0x9b   : > { %s851_s10 = scalar_lea.hbm %s268_s21, 128  ;;  %p857_p3 = scmp.lt.s32.totalorder %s268_s21, %s1733_s3 }
  0x9c   : > { %p852_p9 = scmp.ne.s32.totalorder %s268_s21, %s851_s10  ;;  %p858_p5 = scmp.lt.s32.totalorder %s856_s18, %s851_s10 }
  0x9e   : > { %p854_p2 = pnand %p853_p13, %p852_p9  ;;  %p859_p6 = por %p858_p5, %p857_p3 }
  0xa0   : > { %p855_p10 = pneg %p854_p2 }
  0xa2   : > { %p860_p1 = pnand %p859_p6, %p855_p10 }
  0xa4   : > { %863 = shalt.err (!%p860_p1)
}
  0xa5   : > { %s864_s23 = scalar_lea.vmem %s1448_s20, 128  ;;  %s1102_s6 = smov [#allocation9]  }
  0xa6   : > { %p865_p7 = scmp.ne.s32.totalorder %s1448_s20, %s864_s23  ;;  %s869_s30 = sshll.u32 %s1102_s6, 4  ;;  %s870_s30 = int_to_ptr.vmem [resolvable:$false] %s869_s30 }
  0xa7   : > { %s871_s7 = scalar_lea.vmem %s870_s30, 256  ;;  %p872_p9 = scmp.lt.s32.totalorder %s1448_s20, %s870_s30 }
  0xa8   : > { %p867_p4 = pnand %p865_p7, %p853_p13  ;;  %p873_p2 = scmp.lt.s32.totalorder %s871_s7, %s864_s23 }
  0xaa   : > { %p868_p11 = pneg %p867_p4  ;;  %p874_p8 = por %p873_p2, %p872_p9 }
  0xac   : > { %p875_p0 = pnand %p874_p8, %p868_p11 }
  0xae   : > { %878 = shalt.err (!%p875_p0)
}
  0xaf   : > { %627 = dma.hbm_to_vmem [thread:$0]  (!%p1444_p12), %s268_s21, 128, %s1448_s20, %s1316_s22  }
  0xb0   : > { %p163_p0 = scmp.ne.s32.totalorder %s1045_s0, %s1041_s24  ;;  %p1734_p8 = scmp.eq.s32.totalorder %s1097_s12, 0 }
  0xb1   : > { %p1735_p13 = scmp.ne.s32.totalorder %s1049_s25, %s1045_s0  ;;  %s277_s16 = sand.u32 1, %s1049_s25  }
  0xb2   : > { %p1736_p3 = scmp.eq.s32.totalorder %s1230_s13, 0  ;;  %s145_s17 = ssub.s32 %s1454_s29, %s1456_s5 }
  0xb3   : > { %p159_p10 = por %p1735_p13, %p1734_p8  ;;  %s150_s10 = sadd.s32 1, %s1049_s25 }
  0xb4   : > { %p1488_p5 = por %p163_p0, %p1736_p3  ;;  %p148_p6 = scmp.eq.s32.totalorder %s145_s17, 0 }
  0xb5   : > { %s579_s4 = sshll.u32 %s277_s16, 3  ;;  %s1738_s26 = sadd.s32 6, %s1093_s11 }
  0xb6   : > { %s1737_s14 = scalar_select %p1488_p5, 1, 0 }
  0xb7   : > { %s603_s19 = scalar_select %p159_p10, [#allocation3], [#allocation16] }
  0xb8   : > { %s1496_s18 = scalar_select %p148_p6, %s1049_s25, %s150_s10  }
  0xb9   : > { %s1803_s26 = smov (!%p159_p10, %s1738_s26), 0  ;;  %p1739_p12 = scmp.lt.s32.totalorder %s1097_s12, 2 }
  0xba   : > { %s281_s20 = scalar_lea.vmem [#allocation10], %s579_s4  ;;  %s1743_s6 = sld [smem:[#allocation45_spill]] }
  0xbb   : > { %s1805_s19 = smov (!%p1739_p12, %s603_s19), [#allocation20]  ;;  %p1740_p1 = pmov %p1739_p12 }
  0xbc   : > { %s291_s29 = sshll.u32 %s281_s20, 4  ;;  %s278_s7 = scalar_lea.sflag [#allocation11], %s277_s16  ;;  %s1510_s29 = int_to_ptr.vmem [resolvable:$true] %s291_s29 }
  0xbd   : > { %s1807_s26 = smov (!%p1740_p1, %s1803_s26), 0  ;;  %p1741_p7 = pmov %p1740_p1 }
  0xbe   : > { %s283_s24 = sld [smem:[%s1805_s19 + %s1807_s26]] }
  0xbf   : > { %p1506_p4 = pnand %p1741_p7, %p159_p10 }
  0xc0   : > { %s1744_s17 = smov %s1743_s6 }
  0xc1   : > { %p881_p9 = pneg %p1506_p4  ;;  %s884_s19 = scalar_lea.hbm %s1744_s17, 1024 }
  0xc4   : > { %s580_s5 = sshll.u32 %s283_s24, 7 }
  0xc5   : > { %s289_s30 = scalar_lea.hbm %s1743_s6, %s580_s5 }
  0xc6   : > { %s879_s10 = scalar_lea.hbm %s289_s30, 128  ;;  %p885_p8 = scmp.lt.s32.totalorder %s289_s30, %s1744_s17 }
  0xc7   : > { %p880_p11 = scmp.ne.s32.totalorder %s289_s30, %s879_s10  ;;  %p886_p13 = scmp.lt.s32.totalorder %s884_s19, %s879_s10 }
  0xc9   : > { %p882_p2 = pnand %p881_p9, %p880_p11  ;;  %p887_p10 = por %p886_p13, %p885_p8 }
  0xcb   : > { %p883_p0 = pneg %p882_p2 }
  0xcd   : > { %p888_p3 = pnand %p887_p10, %p883_p0 }
  0xcf   : > { %891 = shalt.err (!%p888_p3)
}
  0xd0   : > { %s892_s16 = scalar_lea.vmem %s1510_s29, 128  ;;  %s1103_s24 = smov [#allocation10]  }
  0xd1   : > { %p893_p6 = scmp.ne.s32.totalorder %s1510_s29, %s892_s16  ;;  %s897_s20 = sshll.u32 %s1103_s24, 4  ;;  %s898_s20 = int_to_ptr.vmem [resolvable:$false] %s897_s20 }
  0xd2   : > { %s899_s1 = scalar_lea.vmem %s898_s20, 256  ;;  %p900_p7 = scmp.lt.s32.totalorder %s1510_s29, %s898_s20 }
  0xd3   : > { %p895_p12 = pnand %p893_p6, %p881_p9  ;;  %p901_p11 = scmp.lt.s32.totalorder %s899_s1, %s892_s16 }
  0xd5   : > { %p896_p1 = pneg %p895_p12  ;;  %p902_p2 = por %p901_p11, %p900_p7 }
  0xd7   : > { %p903_p5 = pnand %p902_p2, %p896_p1 }
  0xd9   : > { %906 = shalt.err (!%p903_p5)
}
  0xda   : > { %632 = dma.hbm_to_vmem [thread:$0]  (!%p1506_p4), %s289_s30, 128, %s1510_s29, %s278_s7  }
  0xdb   : > { %s1745_s3 = sld [smem:[#allocation39_spill]] }
  0xe1   : > { %p1746_p0 = scmp.ne.s32.totalorder %s1745_s3, 0 }
  0xe2   : > { %s1747_s5 = sld [smem:[#allocation40_spill]] (!%p1746_p0)  ;;  %s302_s21 = sand.u32 (!%p1746_p0), 1, %s1081_s8  }
  0xe3   : > { %300 = sbr.rel (%p1746_p0) target bundleno = 286 (0x11e), region = 36  ;;  %s582_s23 = sshll.u32 (!%p1746_p0), %s302_s21, 3 }
  0xe4   : > { %s303_s6 = scalar_lea.sflag (!%p1746_p0), [#allocation5], %s302_s21  ;;  %s306_s10 = scalar_lea.vmem (!%p1746_p0), [#allocation4], %s582_s23 }
  0xe8   : > { %p1748_p9 = scmp.ne.s32.totalorder %s1747_s5, 0 }
  0xea   : > { %1008 = dma.done.wait (%p1748_p9), %s303_s6, 128  }
  0xeb   : > { %1010 = vsyncadd (%p1748_p9), %s303_s6, 4294967168  ;;  %s1749_s19 = sld [smem:[#allocation30_spill]]  ;;  %s311_s22 = sand.u32 1, %s1230_s13  }
  0xec   : > { %s1750_s4 = sld [smem:[#allocation34_spill]]  ;;  %s312_s30 = scalar_lea.sflag [#allocation8], %s311_s22 }
  0xf1   : > { %s313_s26 = sand.u32 1, %s1749_s19  }
  0xf2   : > { %s583_s29 = sshll.u32 %s313_s26, 3  ;;  %p1751_p5 = scmp.ne.s32.totalorder %s1750_s4, 0 }
  0xf3   : > { %s315_s7 = scalar_lea.vmem [#allocation7], %s583_s29 }
  0xf4   : > { %1012 = dma.done.wait (%p1751_p5), %s312_s30, 128  }
  0xf5   : > { %1014 = vsyncadd (%p1751_p5), %s312_s30, 4294967168  ;;  %s322_s16 = sand.u32 1, %s1057_s27   ;;  %p1752_p4 = scmp.ne.s32.totalorder %s1724_s2, 0 }
  0xf6   : > { %s584_s24 = sshll.u32 %s322_s16, 3 }
  0xf7   : > { %s324_s20 = scalar_lea.vmem [#allocation9], %s584_s24 }
  0xf8   : > { %1016 = dma.done.wait (%p1752_p4), %s312_s30, 128  }
  0xf9   : > { %1018 = vsyncadd (%p1752_p4), %s312_s30, 4294967168  ;;  %s329_s13 = sand.u32 1, %s1045_s0   ;;  %p1753_p8 = scmp.ne.s32.totalorder %s1737_s14, 0 }
  0xfa   : > { %s585_s1 = sshll.u32 %s329_s13, 3  ;;  %s330_s3 = scalar_lea.sflag [#allocation11], %s329_s13 }
  0xfb   : > { %s333_s5 = scalar_lea.vmem [#allocation10], %s585_s1 }
  0xfc   : > { %1020 = dma.done.wait (%p1753_p8), %s330_s3, 128  }
  0xfd   : > { %1022 = vsyncadd (%p1753_p8), %s330_s3, 4294967168  ;;  %s1754_s21 = sld [smem:[#allocation28_spill]]  ;;  %v380_v0 = vld [vmem:[%s306_s10] sm:$0xff]  ;;  %v381_v1 = vld [vmem:[%s315_s7] sm:$0xff] }
  0xfe   : > { %s1755_s23 = sld [smem:[#allocation33_spill]]  ;;  %v382_v2 = vld [vmem:[%s324_s20] sm:$0xff]  ;;  %v384_v3 = vadd.f32 %v381_v1, %v380_v0  ;;  %v383_v4 = vld [vmem:[%s333_s5] sm:$0xff]  ;;  %v388_v6 = vmul.f32 0.33333334, %v380_v0  ;;  %s1104_s20 = smov [#allocation12]  }
  0xff   : > { %v391_v8 = vmul.f32 0.33333334, %v381_v1  ;;  %v395_v9 = vmul.f32 0.33333334, %v382_v2  ;;  %s1756_s26 = sld [smem:[#allocation36_spill]]  ;;  %s911_s13 = sshll.u32 %s1104_s20, 4  ;;  %s912_s13 = int_to_ptr.vmem [resolvable:$false] %s911_s13 }
 0x100   : > { %v385_v5 = vadd.f32 %v384_v3, %v382_v2  ;;  %v399_v10 = vmul.f32 0.33333334, %v383_v4  ;;  %s1757_s30 = sld [smem:[#allocation46_spill]]  ;;  %s913_s1 = scalar_lea.vmem %s912_s13, 1024 }
 0x102   : > { %v386_v7 = vadd.f32 %v385_v5, %v383_v4 }
 0x103   : > { %s370_s6 = sand.u32 1, %s1754_s21  }
 0x104   : > { %s586_s19 = sshll.u32 %s370_s6, 5  ;;  %s591_s22 = sshll.u32 %s1755_s23, 7  ;;  %v387_v11 = vmul.f32 0.16666667, %v386_v7 }
 0x105   : > { %s372_s2 = scalar_lea.vmem [#allocation12], %s586_s19  ;;  %s1561_s10 = scalar_lea.sflag [#allocation6], %s370_s6 }
 0x106   : > { %s417_s4 = sshll.u32 %s372_s2, 4  ;;  %s1758_s16 = smov %s1757_s30  ;;  %v389_v12 = vadd.f32 %v388_v6, %v387_v11  ;;  %v392_v13 = vadd.f32 %v391_v8, %v387_v11  ;;  %v396_v14 = vadd.f32 %v395_v9, %v387_v11  ;;  %v400_v15 = vadd.f32 %v399_v10, %v387_v11  ;;  %s1559_s4 = int_to_ptr.vmem [resolvable:$true] %s417_s4 }
 0x107   : > { %s1557_s24 = scalar_lea.hbm %s1757_s30, %s591_s22  ;;  %s907_s7 = scalar_lea.vmem %s1559_s4, 512 }
 0x108   : > { %390 = vst [vmem:[%s372_s2] sm:$0xff] %v389_v12  ;;  %587 = vst [vmem:[%s372_s2 + $0x8] sm:$0xff] %v392_v13  ;;  %p908_p13 = scmp.ne.s32.totalorder %s1559_s4, %s907_s7  ;;  %p1759_p10 = scmp.ne.s32.totalorder %s1756_s26, 0 }
 0x109   : > { %588 = vst [vmem:[%s372_s2 + $0x10] sm:$0xff] %v396_v14  ;;  %589 = vst [vmem:[%s372_s2 + $0x18] sm:$0xff] %v400_v15  ;;  %p914_p12 = scmp.lt.s32.totalorder %s1559_s4, %s912_s13  ;;  %p915_p1 = scmp.lt.s32.totalorder %s913_s1, %s907_s7 }
 0x10a   : > { %p909_p3 = pnand %p908_p13, %p1759_p10 }
 0x10b   : > { %p916_p7 = por %p915_p1, %p914_p12 }
 0x10c   : > { %p910_p6 = pneg %p909_p3 }
 0x10e   : > { %p917_p11 = pnand %p916_p7, %p910_p6 }
 0x110   : > { %920 = shalt.err (!%p917_p11)
}
 0x111   : > { %s921_s3 = scalar_lea.hbm %s1557_s24, 512  ;;  %s925_s23 = scalar_lea.hbm %s1758_s16, 1024 }
 0x112   : > { %p922_p2 = scmp.ne.s32.totalorder %s1557_s24, %s921_s3  ;;  %p926_p5 = scmp.lt.s32.totalorder %s1557_s24, %s1758_s16 }
 0x113   : > { %p927_p4 = scmp.lt.s32.totalorder %s925_s23, %s921_s3 }
 0x114   : > { %p923_p0 = pnand %p922_p2, %p1759_p10 }
 0x115   : > { %p928_p8 = por %p927_p4, %p926_p5 }
 0x116   : > { %p924_p9 = pneg %p923_p0 }
 0x118   : > { %p929_p13 = pnand %p928_p8, %p924_p9 }
 0x11a   : > { %932 = shalt.err (!%p929_p13)
}
 0x11b   : > { %s1105_s2 = smov 128   ;;  %s1106_s22 = smov 256  }
 0x11c   : > { %s1107_s14 = smov 8  }
 0x11d   : > { %610 = dma.vmem_to_hbm [thread:$0]  (%p1759_p10), %s1559_s4, 512, %s1557_s24, %s1561_s10, %s1105_s2, %s1106_s22, %s1107_s14  }
 0x11e PF: > { %s1760_s29 = sld [smem:[#allocation27_spill]]  ;;  %p1763_p6 = scmp.ge.s32.totalorder %s1097_s12, 2 }
 0x11f   : > { %s1761_s30 = sld [smem:[#allocation37_spill]] }
 0x124   : > { %s432_s7 = sand.u32 1, %s1760_s29  }
 0x125   : > { %p1762_p3 = scmp.ne.s32.totalorder %s1761_s30, 0  ;;  %s433_s20 = scalar_lea.sflag [#allocation6], %s432_s7 }
 0x127   : > { %p634_p12 = pnand %p1763_p6, %p1762_p3 }
 0x129   : > { %p635_p1 = pneg %p634_p12 }
 0x12b   : > { %1024 = dma.done.wait (%p635_p1), %s433_s20, 512  }
 0x12c   : > { %1026 = vsyncadd (%p635_p1), %s433_s20, 4294966784  ;;  %s31_s12 = sadd.s32 1, %s1097_s12   ;;  %s1765_s21 = sld [smem:[#allocation28_spill]] }
 0x12d   : > { %p1590_p7 = scmp.ge.s32.totalorder %s31_s12, 4   ;;  %s1766_s22 = sld [smem:[#allocation29_spill]] }
 0x12e   : > { %s1767_s23 = sld [smem:[#allocation35_spill]]  ;;  %s1773_s24 = smov %s1045_s0 }
 0x12f   : > { %s1768_s29 = sld [smem:[#allocation30_spill]]  ;;  %s1774_s0 = smov %s1049_s25 }
 0x130   : > { %s1769_s30 = sld [smem:[#allocation31_spill]]  ;;  %s1775_s25 = smov %s1496_s18 }
 0x131   : > { %s1770_s6 = sld [smem:[#allocation38_spill]]  ;;  %s1776_s26 = smov %s1057_s27 }
 0x132   : > { %s1771_s4 = sld [smem:[#allocation32_spill]]  ;;  %s1777_s27 = smov %s1061_s28 }
 0x133   : > { %s1772_s10 = sld [smem:[#allocation41_spill]]  ;;  %s1778_s28 = smov %s1430_s9 }
 0x134   : > { %s1779_s7 = smov %s1081_s8 }
 0x136   :  { %30 = sbr.rel (!%p1590_p7) target bundleno = 26 (0x1a), region = 121 }
 0x138   : > { %s1780_s8 = smov %s1771_s4 }
 0x139   : > { %s1781_s9 = smov %s1772_s10  ;;  %s1782_s10 = smov %s1093_s11 }
 0x13a   : > { %s1783_s11 = smov %s1785_s15 }
 0x13b   :  { %438 = vsyncpa [#allocation5], 1 }
 0x13c   :  { %440 = vsyncpa [#allocation5 + $0x1], 1 }
 0x13d   :  { %441 = vsyncpa [#allocation8], 1 }
 0x13e   :  { %443 = vsyncpa [#allocation8 + $0x1], 1 }
 0x13f   :  { %444 = vsyncpa [#allocation11], 1 }
 0x140   :  { %446 = vsyncpa [#allocation11 + $0x1], 1 }
 0x141   :  { %447 = vsyncpa [#allocation6], 1 }
 0x142   :  { %449 = vsyncpa [#allocation6 + $0x1], 1 }

</bundles_post_ra>
